<compile_context>
chip_gen: v7x
topology: tpu7x:2x2x1
jax: 0.10.0
libtpu: 0.0.40
codegen_flags: <defaults>
</compile_context>

<pallas_src>
import jax
import jax.numpy as jnp
from jax.experimental import pallas as pl
from jax.experimental.pallas import tpu as pltpu

_LANE = 128            # lane width: hidden dim padded to 128, batch tiles lane-aligned
_MAX_BATCH_TILE = 8192  # per review: sweep 2048/4096/8192; 8192 keeps VMEM use
                        # (lane-padded x ~4 MiB x2 bufs + ~8 MiB intermediates)
                        # well inside the 32 MiB scoped default on all generations.


def _round_up(n, m):
    return ((n + m - 1) // m) * m


def _pick_batch_tile(batch):
    """Batch tile: >= 2 lane-aligned programs when possible (v7x megacore), capped for VMEM."""
    if batch < 2 * _LANE:
        # Tiny batch: single program; block == full array so any shape is legal.
        return batch
    return min(_MAX_BATCH_TILE, _round_up(pl.cdiv(batch, 2), _LANE))


def _mlp_kernel(x_ref, w1_ref, b1_ref, w2_ref, b2_ref, o_ref):
    # x_ref : (TB, D_in)  VMEM   (batch tile, features on lanes)
    # w1_ref: (Hp, D_in)  VMEM   (hidden padded to 128 on sublanes)
    # b1_ref: (Hp, 1)     VMEM
    # w2_ref: (1, Hp)     VMEM
    # b2_ref: (1, 1)      SMEM   (scalar)
    # o_ref : (1, TB)     VMEM   (lane-dense output row for this tile)
    #
    # Layer 1 on the MXU, batch-on-lanes: (Hp, D_in) . (TB, D_in)^T -> (Hp, TB).
    h = jax.lax.dot_general(
        w1_ref[...], x_ref[...],
        dimension_numbers=(((1,), (1,)), ((), ())),
        preferred_element_type=jnp.float32)
    # Bias (lane-broadcast of the (Hp, 1) column) + ReLU on the VPU.
    h = jnp.maximum(h + b1_ref[...], 0.0)
    # Layer 2 on the MXU: (1, Hp) @ (Hp, TB) -> (1, TB), lane-dense.
    z = jnp.dot(w2_ref[...], h, preferred_element_type=jnp.float32) + b2_ref[0, 0]
    # Lane-dense epilogue: sigmoid (EUP) over TB/128 vregs, unmasked store.
    o_ref[...] = jax.nn.sigmoid(z).astype(o_ref.dtype)


def prepare_params(w1, b1, w2, b2):
    """One-time parameter re-layout (do at init, not per forward call).

    w1: (H, D_in), b1: (H,), w2: (D_out, H), b2: (D_out,) -> padded, kernel-ready.
    """
    H, d_in = w1.shape
    d_out = w2.shape[0]
    assert d_out == 1, "kernel is specialized for the module default output_size=1"
    hp = _round_up(H, _LANE)                                     # 100 -> 128

    w1_p = jnp.zeros((hp, d_in), jnp.float32).at[:H, :].set(w1)  # sublane pad, no transpose
    b1_p = jnp.zeros((hp, 1), jnp.float32).at[:H, 0].set(b1)     # column for lane-broadcast
    w2_p = jnp.zeros((1, hp), jnp.float32).at[0, :H].set(w2[0])  # row for (1,Hp)@(Hp,TB)
    b2_p = jnp.asarray(b2, jnp.float32).reshape(1, 1)            # SMEM scalar
    return w1_p, b1_p, w2_p, b2_p


def simple_nn_2layer_forward(x, w1_p, b1_p, w2_p, b2_p):
    """x: (B, D_in) f32; params already prepared via prepare_params(). Returns (B, 1)."""
    B, d_in = x.shape
    hp = w1_p.shape[0]

    tile_b = _pick_batch_tile(B)
    num_tiles = pl.cdiv(B, tile_b)

    # Kernel emits a lane-dense (num_tiles, tile_b) slab; reshaped to (B, 1) below
    # (pure layout plumbing outside the hot loop).
    out2d = pl.pallas_call(
        _mlp_kernel,
        out_shape=jax.ShapeDtypeStruct((num_tiles, tile_b), jnp.float32),
        grid=(num_tiles,),
        in_specs=[
            pl.BlockSpec((tile_b, d_in), lambda i: (i, 0)),            # x tile
            pl.BlockSpec((hp, d_in), lambda i: (0, 0)),                # W1 (padded)
            pl.BlockSpec((hp, 1), lambda i: (0, 0)),                   # b1 column
            pl.BlockSpec((1, hp), lambda i: (0, 0)),                   # W2 row
            pl.BlockSpec((1, 1), lambda i: (0, 0),
                         memory_space=pltpu.SMEM),                     # b2 scalar
        ],
        out_specs=pl.BlockSpec((1, tile_b), lambda i: (i, 0)),
        compiler_params=pltpu.CompilerParams(
            dimension_semantics=("parallel",)),
        cost_estimate=pl.CostEstimate(
            flops=2 * B * d_in * hp + 2 * B * hp,
            transcendentals=B,
            bytes_accessed=B * d_in * 4 + B * 4 + (hp * d_in + 2 * hp + 1) * 4),
    )(x, w1_p, b1_p, w2_p, b2_p)

    return out2d.reshape(-1, 1)[:B]


def _reference(x, w1, b1, w2, b2):
    h = jnp.maximum(x @ w1.T + b1, 0.0)
    return jax.nn.sigmoid(h @ w2.T + b2)


if __name__ == "__main__":
    # Shapes consistent with the module: input_size=32, hidden_size=100, output_size=1.
    B, D_in, H, D_out = 8, 32, 100, 1

    key = jax.random.PRNGKey(0)
    kx, kw1, kb1, kw2, kb2 = jax.random.split(key, 5)

    x = jax.random.normal(kx, (B, D_in), dtype=jnp.float32)
    # Deterministic parameter init (uniform, nn.Linear-style bounds).
    bound1 = 1.0 / (D_in ** 0.5)
    bound2 = 1.0 / (H ** 0.5)
    w1 = jax.random.uniform(kw1, (H, D_in), minval=-bound1, maxval=bound1, dtype=jnp.float32)
    b1 = jax.random.uniform(kb1, (H,), minval=-bound1, maxval=bound1, dtype=jnp.float32)
    w2 = jax.random.uniform(kw2, (D_out, H), minval=-bound2, maxval=bound2, dtype=jnp.float32)
    b2 = jax.random.uniform(kb2, (D_out,), minval=-bound2, maxval=bound2, dtype=jnp.float32)

    # One-time param prep (pad + re-layout), outside the per-call forward path.
    params = prepare_params(w1, b1, w2, b2)
    params = jax.tree_util.tree_map(jax.block_until_ready, params)

    out = simple_nn_2layer_forward(x, *params)
    out = jax.block_until_ready(out)

    ref = _reference(x, w1, b1, w2, b2)
    assert out.shape == (B, D_out)
    assert jnp.allclose(out, ref, atol=1e-5, rtol=1e-5), "mismatch vs reference"

    print("KERNEL_OK")
</pallas_src>

<mosaic_0001>
module attributes {stable_mosaic.version = 11 : i64} {
  func.func @_mlp_kernel(%arg0: i32, %arg1: memref<8x32xf32, #tpu.memory_space<vmem>>, %arg2: memref<128x32xf32, #tpu.memory_space<vmem>>, %arg3: memref<128x1xf32, #tpu.memory_space<vmem>>, %arg4: memref<1x128xf32, #tpu.memory_space<vmem>>, %arg5: memref<1x1xf32, #tpu.memory_space<smem>>, %arg6: memref<1x8xf32, #tpu.memory_space<vmem>>) attributes {dimension_semantics = [#tpu.dimension_semantics<parallel>], iteration_bounds = array<i64: 1>, scalar_prefetch = 0 : i64, scratch_operands = 0 : i64, tpu.core_type = #tpu.core_type<tc>, window_params = [{transform_indices = @transform_0, window_bounds = array<i64: 8, 32>}, {pipeline_mode = #tpu.pipeline_mode<synchronous>, transform_indices = @transform_1, window_bounds = array<i64: 128, 32>}, {pipeline_mode = #tpu.pipeline_mode<synchronous>, transform_indices = @transform_2, window_bounds = array<i64: 128, 1>}, {pipeline_mode = #tpu.pipeline_mode<synchronous>, transform_indices = @transform_3, window_bounds = array<i64: 1, 128>}, {transform_indices = @transform_4, window_bounds = array<i64: 1, 1>}, {transform_indices = @transform_5, window_bounds = array<i64: 1, 8>}]} {
    %c0 = arith.constant 0 : index
    %c0_0 = arith.constant 0 : index
    %0 = vector.load %arg2[%c0, %c0_0] : memref<128x32xf32, #tpu.memory_space<vmem>>, vector<128x32xf32>
    %c0_1 = arith.constant 0 : index
    %c0_2 = arith.constant 0 : index
    %1 = vector.load %arg1[%c0_1, %c0_2] : memref<8x32xf32, #tpu.memory_space<vmem>>, vector<8x32xf32>
    %cst = arith.constant dense<0.000000e+00> : vector<128x8xf32>
    %2 = tpu.matmul %0, %1, %cst {dimension_numbers = #tpu.dot_dimension_numbers<[1], [1], [0], [0], [0, 0, 1, 0], [], []>} : vector<128x32xf32>, vector<8x32xf32>, vector<128x8xf32> -> vector<128x8xf32>
    %c0_3 = arith.constant 0 : index
    %c0_4 = arith.constant 0 : index
    %3 = vector.load %arg3[%c0_3, %c0_4] : memref<128x1xf32, #tpu.memory_space<vmem>>, vector<128x1xf32>
    %4 = vector.broadcast %3 : vector<128x1xf32> to vector<128x8xf32>
    %5 = arith.addf %2, %4 : vector<128x8xf32>
    %cst_5 = arith.constant 0.000000e+00 : f32
    %6 = vector.broadcast %cst_5 : f32 to vector<128x8xf32>
    %7 = arith.maximumf %5, %6 : vector<128x8xf32>
    %c0_6 = arith.constant 0 : index
    %c0_7 = arith.constant 0 : index
    %8 = vector.load %arg4[%c0_6, %c0_7] : memref<1x128xf32, #tpu.memory_space<vmem>>, vector<1x128xf32>
    %cst_8 = arith.constant dense<0.000000e+00> : vector<1x8xf32>
    %9 = tpu.matmul %8, %7, %cst_8 {dimension_numbers = #tpu.dot_dimension_numbers<[1], [0], [0], [1], [0, 0, 1, 1], [], []>} : vector<1x128xf32>, vector<128x8xf32>, vector<1x8xf32> -> vector<1x8xf32>
    %c0_9 = arith.constant 0 : index
    %c0_10 = arith.constant 0 : index
    %10 = memref.load %arg5[%c0_9, %c0_10] : memref<1x1xf32, #tpu.memory_space<smem>>
    %11 = vector.broadcast %10 : f32 to vector<1x8xf32>
    %12 = arith.addf %9, %11 : vector<1x8xf32>
    %13 = arith.negf %12 : vector<1x8xf32>
    %14 = math.exp %13 : vector<1x8xf32>
    %cst_11 = arith.constant 1.000000e+00 : f32
    %15 = vector.broadcast %cst_11 : f32 to vector<1x8xf32>
    %16 = arith.addf %15, %14 : vector<1x8xf32>
    %17 = arith.divf %15, %16 : vector<1x8xf32>
    %c0_12 = arith.constant 0 : index
    %c0_13 = arith.constant 0 : index
    %18 = vector.load %arg6[%c0_12, %c0_13] : memref<1x8xf32, #tpu.memory_space<vmem>>, vector<1x8xf32>
    tpu.vector_store %arg6[%c0_12, %c0_13], %17 {strides = array<i32>} : memref<1x8xf32, #tpu.memory_space<vmem>>, vector<1x8xf32>,
    return
  }
  func.func @transform_0(%arg0: i32) -> (i32, i32) {
    %c0_i32 = arith.constant 0 : i32
    %c0_i32_0 = arith.constant 0 : i32
    return %arg0, %c0_i32 : i32, i32
  }
  func.func @transform_1(%arg0: i32) -> (i32, i32) {
    %c0_i32 = arith.constant 0 : i32
    %c0_i32_0 = arith.constant 0 : i32
    %c0_i32_1 = arith.constant 0 : i32
    return %c0_i32, %c0_i32_0 : i32, i32
  }
  func.func @transform_2(%arg0: i32) -> (i32, i32) {
    %c0_i32 = arith.constant 0 : i32
    %c0_i32_0 = arith.constant 0 : i32
    %c0_i32_1 = arith.constant 0 : i32
    return %c0_i32, %c0_i32_0 : i32, i32
  }
  func.func @transform_3(%arg0: i32) -> (i32, i32) {
    %c0_i32 = arith.constant 0 : i32
    %c0_i32_0 = arith.constant 0 : i32
    %c0_i32_1 = arith.constant 0 : i32
    return %c0_i32, %c0_i32_0 : i32, i32
  }
  func.func @transform_4(%arg0: i32) -> (i32, i32) {
    %c0_i32 = arith.constant 0 : i32
    %c0_i32_0 = arith.constant 0 : i32
    %c0_i32_1 = arith.constant 0 : i32
    return %c0_i32, %c0_i32_0 : i32, i32
  }
  func.func @transform_5(%arg0: i32) -> (i32, i32) {
    %c0_i32 = arith.constant 0 : i32
    %c0_i32_0 = arith.constant 0 : i32
    return %arg0, %c0_i32 : i32, i32
  }
}

</mosaic_0001>

<bundles_post_ra>
// kernel: tpu_custom_call.1
= control target key start
LH: loop header
LB: loop body
LE: loop exit
PB: predicated region body
PF: predicated region fallthrough
CT: control target
= control target key end

     0   :  { %vm135_vm0 = vcmask 261120   ;;  %v615_v3 = vmov 0   ;;  %s793_s0 = inlined_call_operand.vmem [shape: f32[8,32], index: 0, kind: input, shape index: {}]   ;;  %s794_s1 = inlined_call_operand.vmem [shape: f32[128,32], index: 1, kind: input, shape index: {}]   ;;  %s795_s2 = inlined_call_operand.vmem [shape: f32[128,1], index: 2, kind: input, shape index: {}]   ;;  %s796_s3 = inlined_call_operand.vmem [shape: f32[1,128], index: 3, kind: input, shape index: {}]   ;;  %s797_s4 = inlined_call_operand.<no memory space> [shape: f32[1,1], index: 4, kind: input, shape index: {}]   ;;  %s798_s5 = inlined_call_operand.hbm [shape: f32[1,8], index: 5, kind: output, shape index: {}]  }
   0x1   :  { %v38_v0 = vld [vmem:[%s793_s0] sm:$0xff]  ;;  %v23_v2 = vld [vmem:[%s794_s1 + $0x8] sm:$0xff]  ;;  %585 = vset.pattern.permute.xlu0 %v615_v3  ;;  %v24_v4 = vld [vmem:[%s794_s1 + $0x10] sm:$0xff]  ;;  %586 = vset.pattern.permute.xlu1 %v615_v3 }
   0x2   :  { %v22_v1 = vld [vmem:[%s794_s1] sm:$0xff]  ;;  %495 = vmatprep.subr.msk.mxu0 %vm135_vm0, %v38_v0  ;;  %v25_v6 = vld [vmem:[%s794_s1 + $0x18] sm:$0xff]  ;;  %v41_v7 = vld [vmem:[%s795_s2 + $0x10] sm:$0xff] }
   0x3   :  { %497 = vmatprep.mubr.msk.f32.mxu0 %vm135_vm0, %v22_v1  ;;  %496 = vmatpush3.xpose.msk.msra.mxu0 %vm135_vm0, %v38_v0  ;;  %v39_v5 = vld [vmem:[%s795_s2] sm:$0xff]  ;;  %v40_v9 = vld [vmem:[%s795_s2 + $0x8] sm:$0xff]  ;;  %v42_v10 = vld [vmem:[%s795_s2 + $0x18] sm:$0xff] }
   0x4   :  { %57 = vperm.xlu0 %585, %v39_v5   ;;  %v26_v8 = vld [vmem:[%s794_s1 + $0x20] sm:$0xff]  ;;  %67 = vperm.xlu1 %586, %v41_v7   ;;  %v27_v11 = vld [vmem:[%s794_s1 + $0x28] sm:$0xff]  ;;  %v28_v12 = vld [vmem:[%s794_s1 + $0x30] sm:$0xff] }
   0x5   :  { %v43_v13 = vld [vmem:[%s795_s2 + $0x20] sm:$0xff] }
   0x6   :  { %498 = vmatmul.mubr.msk.f32.vlgmr.msra.gmra.mrb[0].mxu0 %vm135_vm0, %v23_v2 }
   0x7   :  { %500 = vmatprep.mubr.msk.f32.mxu0 %vm135_vm0, %v24_v4 }
   0x8   :  { %62 = vperm.xlu0 %585, %v40_v9   ;;  %72 = vperm.xlu1 %586, %v42_v10  }
   0xa   :  { %501 = vmatmul.mubr.msk.f32.gmra.mrb[2].mxu0 %vm135_vm0, %v25_v6 }
   0xb   :  { %503 = vmatprep.mubr.msk.f32.mxu0 %vm135_vm0, %v26_v8 }
   0xc   :  { %11 = vsyncpa [#allocation4], 0  ;;  %v44_v14 = vld [vmem:[%s795_s2 + $0x28] sm:$0xff]  ;;  %v29_v15 = vld [vmem:[%s794_s1 + $0x38] sm:$0xff]  ;;  %77 = vperm.xlu0 %585, %v43_v13   ;;  %v616_v34 = vmov 0.0|0.0   ;;  %vm617_vm1 = vmmov 0  }
   0xd   :  { %v30_v16 = vld [vmem:[%s794_s1 + $0x40] sm:$0xff]  ;;  %82 = vperm.xlu1 %586, %v44_v14   ;;  %v45_v17 = vld [vmem:[%s795_s2 + $0x30] sm:$0xff]  ;;  %v46_v18 = vld [vmem:[%s795_s2 + $0x38] sm:$0xff]  ;;  %556 = vmatprep.subr.bf16.mxu1 %v616_v34  ;;  %v618_v35 = vmov 0.0   ;;  %s619_s8 = smov [#allocation3]   ;;  %vm427_vm2 = vcmask 57344  }
   0xe   :  { %504 = vmatmul.mubr.msk.f32.gmra.mrb[4].mxu0 %vm135_vm0, %v27_v11  ;;  %v31_v19 = vld [vmem:[%s794_s1 + $0x48] sm:$0xff]  ;;  %v32_v20 = vld [vmem:[%s794_s1 + $0x50] sm:$0xff]  ;;  %v47_v21 = vld [vmem:[%s795_s2 + $0x40] sm:$0xff]  ;;  %553 = vmatprep.mubr.msk.f32.mxu1 %vm617_vm1, %v618_v35  ;;  %s435_s9 = sshll.u32 %s619_s8, 4  ;;  %s436_s9 = int_to_ptr.vmem [resolvable:$true] %s435_s9 }
   0xf   :  { %506 = vmatprep.mubr.msk.f32.mxu0 %vm135_vm0, %v28_v12  ;;  %v48_v22 = vld [vmem:[%s795_s2 + $0x48] sm:$0xff]  ;;  %v33_v23 = vld [vmem:[%s794_s1 + $0x58] sm:$0xff]  ;;  %v34_v24 = vld [vmem:[%s794_s1 + $0x60] sm:$0xff]  ;;  %s595_s10 = scalar_lea.vmem %s436_s9, 32  ;;  %p596_p1 = scmp.lt.s32.totalorder %s436_s9, %s436_s9 }
  0x10   :  { %87 = vperm.xlu0 %585, %v45_v17   ;;  %v49_v25 = vld [vmem:[%s795_s2 + $0x50] sm:$0xff]  ;;  %v50_v26 = vld [vmem:[%s795_s2 + $0x58] sm:$0xff]  ;;  %v35_v27 = vld [vmem:[%s794_s1 + $0x68] sm:$0xff] }
  0x11   :  { %92 = vperm.xlu1 %586, %v46_v18   ;;  %v36_v28 = vld [vmem:[%s794_s1 + $0x70] sm:$0xff]  ;;  %v51_v29 = vld [vmem:[%s795_s2 + $0x60] sm:$0xff]  ;;  %v52_v30 = vld [vmem:[%s795_s2 + $0x68] sm:$0xff] }
  0x12   :  { %507 = vmatmul.mubr.msk.f32.gmra.mrb[6].mxu0 %vm135_vm0, %v29_v15  ;;  %v37_v31 = vld [vmem:[%s794_s1 + $0x78] sm:$0xff]  ;;  %v53_v32 = vld [vmem:[%s795_s2 + $0x70] sm:$0xff] }
  0x13   :  { %509 = vmatprep.mubr.msk.f32.mxu0 %vm135_vm0, %v30_v16  ;;  %v54_v33 = vld [vmem:[%s795_s2 + $0x78] sm:$0xff] }
  0x14   :  { %97 = vperm.xlu0 %585, %v47_v21  }
  0x15   :  { %102 = vperm.xlu1 %586, %v48_v22  }
  0x16   :  { %510 = vmatmul.mubr.msk.f32.gmra.mrb[8].mxu0 %vm135_vm0, %v31_v19 }
  0x17   :  { %512 = vmatprep.mubr.msk.f32.mxu0 %vm135_vm0, %v32_v20 }
  0x18   :  { %107 = vperm.xlu0 %585, %v49_v25  }
  0x19   :  { %112 = vperm.xlu1 %586, %v50_v26  }
  0x1a   :  { %513 = vmatmul.mubr.msk.f32.gmra.mrb[10].mxu0 %vm135_vm0, %v33_v23 }
  0x1b   :  { %515 = vmatprep.mubr.msk.f32.mxu0 %vm135_vm0, %v34_v24 }
  0x1c   :  { %117 = vperm.xlu0 %585, %v51_v29  }
  0x1d   :  { %122 = vperm.xlu1 %586, %v52_v30  }
  0x1e   :  { %516 = vmatmul.mubr.msk.f32.gmra.mrb[12].mxu0 %vm135_vm0, %v35_v27 }
  0x1f   :  { %518 = vmatprep.mubr.msk.f32.mxu0 %vm135_vm0, %v36_v28 }
  0x20   :  { %127 = vperm.xlu0 %585, %v53_v32  }
  0x21   :  { %132 = vperm.xlu1 %586, %v54_v33  }
  0x22   :  { %519 = vmatmul.mubr.msk.f32.gmra.mrb[14].mxu0 %vm135_vm0, %v37_v31 }
  0x83   :  { %v68_v36 = vpop.permute.xlu1 %67  ;;  %v58_v37 = vpop.permute.xlu0 %57 }
  0x87   :  { %v73_v38 = vpop.permute.xlu1 %72  ;;  %v63_v39 = vpop.permute.xlu0 %62 }
  0x8b   :  { %v78_v41 = vpop.permute.xlu0 %77 }
  0x8c   :  { %v83_v40 = vpop.permute.xlu1 %82 }
  0x8f   :  { %v88_v50 = vpop.permute.xlu0 %87 }
  0x90   :  { %v93_v47 = vpop.permute.xlu1 %92 }
  0x93   :  { %v98_v63 = vpop.permute.xlu0 %97 }
  0x94   :  { %v103_v60 = vpop.permute.xlu1 %102 }
  0x97   :  { %v108_v11 = vpop.permute.xlu0 %107 }
  0x98   :  { %v113_v8 = vpop.permute.xlu1 %112 }
  0x9b   :  { %v118_v24 = vpop.permute.xlu0 %117 }
  0x9c   :  { %v123_v21 = vpop.permute.xlu1 %122 }
  0xa0   :  { %v133_v33 = vpop.permute.xlu1 %132 }
  0xd9   :  { %v499_v42 = vpop.f32.mrb[0].mxu0 }
  0xda   :  { %v259_v43 = vadd.f32 %v499_v42, %v63_v39  ;;  %v253_v44 = vpop.f32.mrb[1].mxu0 }
  0xdb   :  { %v254_v45 = vadd.f32 %v253_v44, %v58_v37  ;;  %v128_v37 = vpop.permute.xlu0 %127 }
  0xdc   :  { %v333_v46 = vmax.f32 %v259_v43, 0.0 }
  0xdd   :  { %v332_v48 = vmax.f32 %v254_v45, 0.0  ;;  %v502_v49 = vpop.f32.mrb[2].mxu0  ;;  %v348_v45 = vld [vmem:[%s796_s3] sm:$0x1]  ;;  %s591_s3 = scalar_lea.vmem %s436_s9, 16 }
  0xde   :  { %v269_v51 = vadd.f32 %v502_v49, %v73_v38  ;;  %v263_v52 = vpop.f32.mrb[3].mxu0  ;;  %p592_p0 = scmp.ne.s32.totalorder %s436_s9, %s591_s3  ;;  %p597_p2 = scmp.lt.s32.totalorder %s595_s10, %s591_s3 }
  0xdf   :  { %v264_v53 = vadd.f32 %v263_v52, %v68_v36  ;;  %v557_v54 = vpack.c.bf16 %v333_v46, %v332_v48  ;;  %v350_v46 = vstv %s797_s4 }
  0xe0   :  { %v335_v55 = vmax.f32 %v269_v51, 0.0  ;;  %p598_p3 = por %p597_p2, %p596_p1 }
  0xe1   :  { %v334_v56 = vmax.f32 %v264_v53, 0.0  ;;  %v505_v57 = vpop.f32.mrb[4].mxu0  ;;  %558 = vmatpush3.bf16.msra.mxu1 %v557_v54 }
  0xe2   :  { %v279_v58 = vadd.f32 %v505_v57, %v83_v40  ;;  %v273_v59 = vpop.f32.mrb[5].mxu0  ;;  %559 = vmatprep.subr.bf16.mxu1 %v616_v34  ;;  %p599_p4 = pnand %p598_p3, %p592_p0 }
  0xe3   :  { %v560_v61 = vpack.c.bf16 %v335_v55, %v334_v56  ;;  %v274_v62 = vadd.f32 %v273_v59, %v78_v41 }
  0xe4   :  { %v337_v0 = vmax.f32 %v279_v58, 0.0 }
  0xe5   :  { %v336_v1 = vmax.f32 %v274_v62, 0.0  ;;  %v508_v2 = vpop.f32.mrb[6].mxu0  ;;  %561 = vmatpush3.bf16.msra.mxu1 %v560_v61 }
  0xe6   :  { %v289_v3 = vadd.f32 %v508_v2, %v93_v47  ;;  %v283_v4 = vpop.f32.mrb[7].mxu0  ;;  %562 = vmatprep.subr.bf16.mxu1 %v616_v34 }
  0xe7   :  { %v563_v5 = vpack.c.bf16 %v337_v0, %v336_v1  ;;  %v284_v6 = vadd.f32 %v283_v4, %v88_v50 }
  0xe8   :  { %v339_v7 = vmax.f32 %v289_v3, 0.0 }
  0xe9   :  { %v338_v9 = vmax.f32 %v284_v6, 0.0  ;;  %v511_v10 = vpop.f32.mrb[8].mxu0  ;;  %564 = vmatpush3.bf16.msra.mxu1 %v563_v5 }
  0xea   :  { %v299_v12 = vadd.f32 %v511_v10, %v103_v60  ;;  %v293_v13 = vpop.f32.mrb[9].mxu0  ;;  %565 = vmatprep.subr.bf16.mxu1 %v616_v34 }
  0xeb   :  { %v566_v14 = vpack.c.bf16 %v339_v7, %v338_v9  ;;  %v294_v15 = vadd.f32 %v293_v13, %v98_v63 }
  0xec   :  { %v341_v16 = vmax.f32 %v299_v12, 0.0 }
  0xed   :  { %v340_v17 = vmax.f32 %v294_v15, 0.0  ;;  %v514_v18 = vpop.f32.mrb[10].mxu0  ;;  %567 = vmatpush3.bf16.msra.mxu1 %v566_v14 }
  0xee   :  { %v309_v19 = vadd.f32 %v514_v18, %v113_v8  ;;  %v303_v20 = vpop.f32.mrb[11].mxu0  ;;  %568 = vmatprep.subr.bf16.mxu1 %v616_v34 }
  0xef   :  { %v569_v22 = vpack.c.bf16 %v341_v16, %v340_v17  ;;  %v304_v23 = vadd.f32 %v303_v20, %v108_v11 }
  0xf0   :  { %v343_v25 = vmax.f32 %v309_v19, 0.0 }
  0xf1   :  { %v342_v26 = vmax.f32 %v304_v23, 0.0  ;;  %v517_v27 = vpop.f32.mrb[12].mxu0  ;;  %570 = vmatpush3.bf16.msra.mxu1 %v569_v22 }
  0xf2   :  { %v319_v28 = vadd.f32 %v517_v27, %v123_v21  ;;  %v313_v29 = vpop.f32.mrb[13].mxu0  ;;  %571 = vmatprep.subr.bf16.mxu1 %v616_v34 }
  0xf3   :  { %v572_v30 = vpack.c.bf16 %v343_v25, %v342_v26  ;;  %v314_v31 = vadd.f32 %v313_v29, %v118_v24 }
  0xf4   :  { %v345_v32 = vmax.f32 %v319_v28, 0.0 }
  0xf5   :  { %v344_v35 = vmax.f32 %v314_v31, 0.0  ;;  %v520_v36 = vpop.f32.mrb[14].mxu0  ;;  %573 = vmatpush3.bf16.msra.mxu1 %v572_v30 }
  0xf6   :  { %v329_v38 = vadd.f32 %v520_v36, %v133_v33  ;;  %v323_v39 = vpop.f32.mrb[15].mxu0  ;;  %574 = vmatprep.subr.bf16.mxu1 %v616_v34 }
  0xf7   :  { %v575_v40 = vpack.c.bf16 %v345_v32, %v344_v35  ;;  %v324_v41 = vadd.f32 %v323_v39, %v128_v37 }
  0xf8   :  { %v347_v42 = vmax.f32 %v329_v38, 0.0 }
  0xf9   :  { %v346_v43 = vmax.f32 %v324_v41, 0.0  ;;  %576 = vmatpush3.bf16.msra.mxu1 %v575_v40 }
  0xfa   :  { %577 = vmatprep.subr.bf16.mxu1 %v616_v34 }
  0xfb   :  { %v578_v44 = vpack.c.bf16 %v347_v42, %v346_v43 }
  0xfd   :  { %579 = vmatpush3.bf16.msra.mxu1 %v578_v44 }
 0x100   :  { %554 = vmatmul.mubr.f32.vlgmr.msra.gmra.mrb[0].mxu1 %v348_v45 }
 0x1d3   :  { %v417_v47 = vpop.f32.mrb[0].mxu1 }
 0x1d4   :  { %v418_v48 = vadd.f32 %v417_v47, %v350_v46  ;;  %v555_v49 = vpop.f32.mrb[1].mxu1 }
 0x1d6   :  { %v460_v50 = vmul.f32 -1.442695, %v418_v48 }
 0x1d8   :  { %587 = vpow2.f32 %v460_v50 }
 0x1e2   :  { %v588_v51 = vpop.eup %587 }
 0x1e3   :  { %v424_v52 = vadd.f32 1.0, %v588_v51 }
 0x1e5   :  { %589 = vrcp.f32 %v424_v52 }
 0x1ef   :  { %v590_v34 = vpop.eup %589 }
 0x1f0   :  { %428 = vst.msk [vmem:[#allocation3] sm:$0x1] %vm427_vm2, %v590_v34 }
 0x1f1   :  { %602 = shalt.err (!%p599_p4)
}
 0x1f2   :  { %s603_s12 = scalar_lea.hbm %s798_s5, 16 }
 0x1f3   :  { %p604_p5 = scmp.ne.s32.totalorder %s798_s5, %s603_s12  ;;  %p607_p6 = scmp.lt.u32.totalorder %s603_s12, %s798_s5 }
 0x1f5   :  { %p609_p7 = pnand %p607_p6, %p604_p5 }
 0x1f7   :  { %612 = shalt.err (!%p609_p7)
}
 0x1f8   :  { %438 = dma.vmem_to_hbm [thread:$0]  %s436_s9, 16, %s798_s5, [#allocation4]  }
 0x1f9   :  { %613 = dma.done.wait [#allocation4], 16  }
 0x1fa   :  { %614 = vsyncadd [#allocation4], 4294967280 }
 0x1fb   :  { %442 = vsyncpa [#allocation4], 1 }

</bundles_post_ra>
